<compile_context>
chip_gen: v6e
topology: v6e:2x2x1
jax: 0.10.0
libtpu: 0.0.40
codegen_flags: <defaults>
</compile_context>

<pallas_src>
import math

import jax
import jax.numpy as jnp
from jax.experimental import pallas as pl
from jax.experimental.pallas import tpu as pltpu


def _make_pe(d_model: int, max_len: int) -> jnp.ndarray:
    """Build the sinusoidal positional-embedding buffer, shape (max_len, d_model)."""
    pos = jnp.arange(max_len, dtype=jnp.float32)[:, None]                       # (L, 1)
    div = jnp.exp(jnp.arange(0, d_model, 2, dtype=jnp.float32)
                  * (-math.log(10000.0) / d_model))                             # (D/2,)
    ang = pos * div                                                              # (L, D/2)
    pe = jnp.zeros((max_len, d_model), dtype=jnp.float32)
    pe = pe.at[:, 0::2].set(jnp.sin(ang))
    pe = pe.at[:, 1::2].set(jnp.cos(ang))
    return pe


def _choose_seq_tile(S: int, D: int, itemsize: int, target_bytes: int = 2 << 20) -> int:
    """Pick a sequence-tile size TS: multiple of 8, ~target_bytes per (TS, D) block."""
    ts = (target_bytes // max(1, D * itemsize)) // 8 * 8
    ts = max(8, ts)
    if S <= ts:
        return S            # full-S block (always legal: equals the full array dim)
    return ts               # multiple of 8 -> satisfies (8,128) BlockSpec constraint


def _sin_embed_kernel(d_ref, x_ref, pe_ref, o_ref):
    # d_ref: SMEM scalar (1,) f32; x_ref/o_ref: (1, TS, D) VMEM; pe_ref: (TS, D) VMEM.
    d = d_ref[0]
    o_ref[...] = (x_ref[...] + d * pe_ref[...]).astype(o_ref.dtype)


def sinusoidal_embedding(x: jnp.ndarray, d, pe: jnp.ndarray) -> jnp.ndarray:
    """x: (B, S, D); d: python/JAX scalar; pe: (max_len, D) f32 buffer."""
    B, S, D = x.shape
    if S > pe.shape[0]:
        raise ValueError(f"sequence length {S} exceeds max_len {pe.shape[0]}")
    if D % 128 != 0:
        # TODO(synk): for D not a multiple of 128, pad D in the wrapper to keep
        # lane-dense (unmasked) stores; full-D blocks below remain correct either way.
        pass

    itemsize = jnp.dtype(x.dtype).itemsize
    pe_s = pe[:S, :].astype(x.dtype)                         # glue slice + dtype match
    d_arr = jnp.asarray(d, dtype=jnp.float32).reshape((1,))  # 32-bit SMEM scalar

    TS = _choose_seq_tile(S, D, itemsize)
    s_tiles = pl.cdiv(S, TS)

    block_bytes = TS * D * itemsize
    # x, pe, out double-buffered (~6 blocks) + headroom; cap at 32 MiB (safe on all chips).
    vmem_limit = int(min(32 * 1024 * 1024, max(8 * 1024 * 1024, 8 * block_bytes)))

    cost = pl.CostEstimate(
        flops=2 * B * S * D,
        transcendentals=0,
        bytes_accessed=(2 * B * S * D + S * D) * itemsize,
    )

    return pl.pallas_call(
        _sin_embed_kernel,
        out_shape=jax.ShapeDtypeStruct((B, S, D), x.dtype),
        grid=(s_tiles, B),                                   # B innermost: pe block reused
        in_specs=[
            pl.BlockSpec(memory_space=pltpu.SMEM),           # d (scalar)
            pl.BlockSpec((1, TS, D), lambda s, b: (b, s, 0)),  # x tile
            pl.BlockSpec((TS, D), lambda s, b: (s, 0)),        # pe tile (constant over b)
        ],
        out_specs=pl.BlockSpec((1, TS, D), lambda s, b: (b, s, 0)),
        compiler_params=pltpu.CompilerParams(
            dimension_semantics=("parallel", "parallel"),
            vmem_limit_bytes=vmem_limit,
        ),
        cost_estimate=cost,
    )(d_arr, x, pe_s)


if __name__ == "__main__":
    # Small, module-consistent shapes: batch=2, seq=8, d_model=128, max_len=10
    d_model, max_len = 128, 10
    B, S = 2, 8

    key = jax.random.PRNGKey(0)
    x = jax.random.normal(key, (B, S, d_model), dtype=jnp.float32)
    d = 0.5

    pe = _make_pe(d_model, max_len)

    out = sinusoidal_embedding(x, d, pe)
    out = jax.block_until_ready(out)

    # reference check (plain JAX)
    ref = x + jnp.float32(d) * pe[None, :S, :]
    assert out.shape == (B, S, d_model)
    assert jnp.allclose(out, ref, atol=1e-6), "mismatch vs reference"

    print("KERNEL_OK")
</pallas_src>

<mosaic_0001>
module attributes {stable_mosaic.version = 11 : i64} {
  func.func @_sin_embed_kernel(%arg0: i32, %arg1: i32, %arg2: memref<1xf32, #tpu.memory_space<smem>>, %arg3: memref<1x8x128xf32, #tpu.memory_space<vmem>>, %arg4: memref<8x128xf32, #tpu.memory_space<vmem>>, %arg5: memref<1x8x128xf32, #tpu.memory_space<vmem>>) attributes {dimension_semantics = [#tpu.dimension_semantics<parallel>, #tpu.dimension_semantics<parallel>], iteration_bounds = array<i64: 1, 2>, scalar_prefetch = 0 : i64, scratch_operands = 0 : i64, tpu.core_type = #tpu.core_type<tc>, window_params = [{transform_indices = @transform_0, window_bounds = array<i64: 1>}, {transform_indices = @transform_1, window_bounds = array<i64: 1, 8, 128>}, {transform_indices = @transform_2, window_bounds = array<i64: 8, 128>}, {transform_indices = @transform_3, window_bounds = array<i64: 1, 8, 128>}]} {
    %c0 = arith.constant 0 : index
    %0 = memref.load %arg2[%c0] : memref<1xf32, #tpu.memory_space<smem>>
    %c0_0 = arith.constant 0 : index
    %c0_1 = arith.constant 0 : index
    %c0_2 = arith.constant 0 : index
    %1 = vector.load %arg3[%c0_0, %c0_1, %c0_2] : memref<1x8x128xf32, #tpu.memory_space<vmem>>, vector<1x8x128xf32>
    %c0_3 = arith.constant 0 : index
    %c0_4 = arith.constant 0 : index
    %2 = vector.load %arg4[%c0_3, %c0_4] : memref<8x128xf32, #tpu.memory_space<vmem>>, vector<8x128xf32>
    %3 = vector.broadcast %0 : f32 to vector<8x128xf32>
    %4 = arith.mulf %3, %2 : vector<8x128xf32>
    %5 = vector.shape_cast %4 : vector<8x128xf32> to vector<1x8x128xf32>
    %6 = arith.addf %1, %5 : vector<1x8x128xf32>
    %c0_5 = arith.constant 0 : index
    %c0_6 = arith.constant 0 : index
    %c0_7 = arith.constant 0 : index
    %7 = vector.load %arg5[%c0_5, %c0_6, %c0_7] : memref<1x8x128xf32, #tpu.memory_space<vmem>>, vector<1x8x128xf32>
    tpu.vector_store %arg5[%c0_5, %c0_6, %c0_7], %6 {strides = array<i32>} : memref<1x8x128xf32, #tpu.memory_space<vmem>>, vector<1x8x128xf32>,
    return
  }
  func.func @transform_0(%arg0: i32, %arg1: i32) -> i32 {
    %c0_i32 = arith.constant 0 : i32
    %c0_i32_0 = arith.constant 0 : i32
    return %c0_i32 : i32
  }
  func.func @transform_1(%arg0: i32, %arg1: i32) -> (i32, i32, i32) {
    %c0_i32 = arith.constant 0 : i32
    %c0_i32_0 = arith.constant 0 : i32
    return %arg1, %arg0, %c0_i32 : i32, i32, i32
  }
  func.func @transform_2(%arg0: i32, %arg1: i32) -> (i32, i32) {
    %c0_i32 = arith.constant 0 : i32
    %c0_i32_0 = arith.constant 0 : i32
    return %arg0, %c0_i32 : i32, i32
  }
  func.func @transform_3(%arg0: i32, %arg1: i32) -> (i32, i32, i32) {
    %c0_i32 = arith.constant 0 : i32
    %c0_i32_0 = arith.constant 0 : i32
    return %arg1, %arg0, %c0_i32 : i32, i32, i32
  }
}

</mosaic_0001>

<bundles_post_ra>
// kernel: tpu_custom_call.1
= control target key start
LH: loop header
LB: loop body
LE: loop exit
PB: predicated region body
PF: predicated region fallthrough
CT: control target
= control target key end

     0   :  { %s753_s0 = inlined_call_operand.<no memory space> [shape: f32[1], index: 0, kind: input, shape index: {}]   ;;  %s754_s1 = inlined_call_operand.hbm [shape: f32[2,8,128], index: 1, kind: input, shape index: {}]   ;;  %s755_s2 = inlined_call_operand.hbm [shape: f32[8,128], index: 2, kind: input, shape index: {}]   ;;  %s756_s3 = inlined_call_operand.hbm [shape: f32[2,8,128], index: 3, kind: output, shape index: {}]  }
   0x1   :  { %8 = sst [smem:[#allocation2]] %s753_s0 }
   0x2   :  { %9 = vsyncpa [#allocation4], 0 }
   0x3   :  { %11 = vsyncpa [#allocation4 + $0x1], 0 }
   0x4   :  { %12 = vsyncpa [#allocation7], 0 }
   0x5   :  { %13 = vsyncpa [#allocation5], 0 }
   0x6   :  { %15 = vsyncpa [#allocation5 + $0x1], 0  ;;  %s592_s14 = smov 0   ;;  %s594_s15 = smov 0  }
   0x7   :  { %s596_s16 = smov 0   ;;  %s598_s17 = smov 0  }
   0x8   :  { %s600_s18 = smov 0   ;;  %s602_s19 = smov 0  }
   0x9 LB: > { %s338_s0 = sadd.s32 4294967295, %s564_s19   ;;  %s339_s20 = sadd.s32 4294967294, %s564_s19   ;;  %s564_s19 = sphi %s602_s19, %s21_s19   ;;  %s560_s18 = sphi %s600_s18, %s773_s18   ;;  %s556_s17 = sphi %s598_s17, %s772_s17   ;;  %s552_s16 = sphi %s596_s16, %s771_s16   ;;  %s548_s15 = sphi %s594_s15, %s770_s15   ;;  %s544_s14 = sphi %s592_s14, %s769_s14  }
   0xa   : > { %p76_p0 = scmp.ne.s32.totalorder %s548_s15, %s544_s14  ;;  %p626_p1 = scmp.eq.s32.totalorder %s338_s0, 0 }
   0xb   : > { %p630_p2 = scmp.eq.s32.totalorder %s338_s0, 1  ;;  %p134_p3 = scmp.eq.s32.totalorder %s339_s20, 1 }
   0xc   : > { %p636_p4 = por %p626_p1, %p76_p0  ;;  %p340_p5 = scmp.ge.s32.totalorder %s564_s19, 1 }
   0xd   : > { %p641_p6 = por %p134_p3, %p76_p0  ;;  %p141_p7 = scmp.lt.s32.totalorder %s564_s19, 3 }
   0xe   : > { %s760_s23 = scalar_select %p636_p4, 1, 0 }
   0xf   : > { %s761_s24 = scalar_select %p641_p6, 1, 0 }
  0x10   : > { %p646_p8 = pnand %p340_p5, %p141_p7  ;;  %s566_s26 = smov [#allocation6]  }
  0x11   : > { %s159_s27 = sshll.u32 %s566_s26, 4  ;;  %s30_s29 = sadd.s32 1, %s560_s18  ;;  %s160_s27 = int_to_ptr.vmem [resolvable:$true] %s159_s27 }
  0x12   : > { %p361_p10 = pneg %p646_p8  ;;  %s63_s30 = sadd.s32 1, %s552_s16 }
  0x13   : > { %p31_p12 = scmp.ge.s32.totalorder %s30_s29, 2  ;;  %s437_s4 = scalar_lea.vmem %s160_s27, 128 }
  0x14   : > { %p655_p11 = pnand %p361_p10, %p626_p1  ;;  %p438_p0 = scmp.ne.s32.totalorder %s160_s27, %s437_s4 }
  0x15   : > { %p445_p7 = scmp.lt.s32.totalorder %s160_s27, %s160_s27  ;;  %p446_p6 = scmp.lt.s32.totalorder %s437_s4, %s437_s4 }
  0x16   : > { %p428_p13 = pneg %p655_p11 }
  0x17   : > { %p447_p9 = por %p446_p6, %p445_p7 }
  0x18   : > { %p440_p3 = pnand %p438_p0, %p428_p13 }
  0x1a   : > { %p441_p5 = pneg %p440_p3 }
  0x1c   : > { %p448_p4 = pnand %p447_p9, %p441_p5 }
  0x1e   : > { %451 = shalt.err (!%p448_p4)
}
  0x1f   : > { %364 = dma.hbm_to_vmem [thread:$0]  (!%p655_p11), %s755_s2, 128, %s160_s27, [#allocation7]  }
  0x20   : > { %s775_s29 = smov (%p31_p12, %s30_s29), 0  ;;  %p70_p6 = scmp.ne.s32.totalorder %s552_s16, %s548_s15 }
  0x21   : > { %p71_p4 = scmp.eq.s32.totalorder %s564_s19, 0  ;;  %s58_s7 = ssub.s32 %s560_s18, %s775_s29 }
  0x22   : > { %p374_p9 = scmp.lt.s32.totalorder %s564_s19, 2  ;;  %p61_p10 = scmp.eq.s32.totalorder %s58_s7, 0 }
  0x23   : > { %p72_p13 = por %p71_p4, %p70_p6  ;;  %p678_p0 = por %p630_p2, %p70_p6 }
  0x24   : > { %s170_s9 = sand.u32 1, %s552_s16   ;;  %s344_s12 = sshll.u32 %s560_s18, 7 }
  0x25   : > { %s684_s10 = scalar_select %p61_p10, %s552_s16, %s63_s30  }
  0x26   : > { %s343_s11 = sshll.u32 %s170_s9, 3  ;;  %s180_s20 = scalar_lea.hbm %s754_s1, %s344_s12 }
  0x27   : > { %s174_s26 = scalar_lea.vmem [#allocation3], %s343_s11  ;;  %p690_p11 = pnand %p374_p9, %p72_p13 }
  0x28   : > { %s182_s27 = sshll.u32 %s174_s26, 4  ;;  %s171_s22 = scalar_lea.sflag [#allocation4], %s170_s9  ;;  %s183_s27 = int_to_ptr.vmem [resolvable:$true] %s182_s27 }
  0x29   : > { %p454_p2 = pneg %p690_p11  ;;  %s465_s4 = scalar_lea.vmem %s183_s27, 128 }
  0x2a   : > { %p466_p12 = scmp.ne.s32.totalorder %s183_s27, %s465_s4  ;;  %s567_s30 = smov [#allocation3]  }
  0x2b   : > { %s470_s5 = sshll.u32 %s567_s30, 4  ;;  %s471_s5 = int_to_ptr.vmem [resolvable:$false] %s470_s5 }
  0x2c   : > { %p468_p3 = pnand %p466_p12, %p454_p2  ;;  %s472_s6 = scalar_lea.vmem %s471_s5, 256 }
  0x2d   : > { %p473_p7 = scmp.lt.s32.totalorder %s183_s27, %s471_s5  ;;  %p474_p6 = scmp.lt.s32.totalorder %s472_s6, %s465_s4 }
  0x2e   : > { %p469_p5 = pneg %p468_p3 }
  0x2f   : > { %p475_p4 = por %p474_p6, %p473_p7 }
  0x31   : > { %p476_p10 = pnand %p475_p4, %p469_p5 }
  0x33   : > { %479 = shalt.err (!%p476_p10)
}
  0x34   : > { %368 = dma.hbm_to_vmem [thread:$0]  (!%p690_p11), %s180_s20, 128, %s183_s27, %s171_s22  }
  0x35   : > { %191 = sbr.rel (%p646_p8) target bundleno = 85 (0x55), region = 32  ;;  %s701_s7 = sand.u32 (!%p646_p8), 1, %s548_s15  }
  0x36   : > { %s346_s9 = sshll.u32 (!%p646_p8), %s701_s7, 3  ;;  %s194_s11 = scalar_lea.sflag (!%p646_p8), [#allocation4], %s701_s7 }
  0x37   : > { %s197_s12 = scalar_lea.vmem (!%p646_p8), [#allocation3], %s346_s9  ;;  %p766_p9 = scmp.ne.s32.totalorder (!%p646_p8), %s760_s23, 0 }
  0x3a   : > { %531 = dma.done.wait (%p766_p9), %s194_s11, 128  }
  0x3b   : > { %533 = vsyncadd (%p766_p9), %s194_s11, 4294967168 }
  0x3c   : > { %535 = dma.done.wait (%p626_p1), [#allocation7], 128  }
  0x3d   : > { %537 = vsyncadd (%p626_p1), [#allocation7], 4294967168  ;;  %s224_s25 = sld [smem:[#allocation2]]  ;;  %v225_v0 = vld [vmem:[%s197_s12] sm:$0xff]  ;;  %v226_v1 = vld [vmem:[#allocation6] sm:$0xff]  ;;  %s223_s13 = scalar_lea.vmem [#allocation8], %s346_s9 }
  0x3e   : > { %s246_s0 = sshll.u32 %s223_s13, 4  ;;  %s350_s20 = sshll.u32 %s556_s17, 7  ;;  %s247_s0 = int_to_ptr.vmem [resolvable:$true] %s246_s0 }
  0x3f   : > { %s244_s27 = scalar_lea.hbm %s756_s3, %s350_s20  ;;  %s232_s21 = scalar_lea.sflag [#allocation5], %s701_s7 }
  0x40   : > { %s480_s28 = scalar_lea.vmem %s247_s0, 128  ;;  %s568_s22 = smov [#allocation8]  }
  0x41   : > { %p481_p1 = scmp.ne.s32.totalorder %s247_s0, %s480_s28  ;;  %s484_s4 = sshll.u32 %s568_s22, 4  ;;  %s485_s4 = int_to_ptr.vmem [resolvable:$false] %s484_s4 }
  0x42   : > { %s486_s30 = scalar_lea.vmem %s485_s4, 256  ;;  %p487_p11 = scmp.lt.s32.totalorder %s247_s0, %s485_s4 }
  0x43   : > { %v227_v2 = vstv %s224_s25  ;;  %p482_p8 = pnand %p481_p1, %p678_p0  ;;  %p488_p2 = scmp.lt.s32.totalorder %s486_s30, %s480_s28 }
  0x44   : > { %v228_v3 = vmul.f32 %v227_v2, %v226_v1 }
  0x45   : > { %p483_p13 = pneg %p482_p8  ;;  %p489_p12 = por %p488_p2, %p487_p11 }
  0x46   : > { %v229_v4 = vadd.f32 %v228_v3, %v225_v0 }
  0x47   : > { %p490_p3 = pnand %p489_p12, %p483_p13 }
  0x48   : > { %230 = vst [vmem:[%s223_s13] sm:$0xff] %v229_v4 }
  0x49   : > { %493 = shalt.err (!%p490_p3)
}
  0x4a   : > { %s494_s17 = scalar_lea.hbm %s244_s27, 128  ;;  %s498_s7 = scalar_lea.hbm %s756_s3, 256 }
  0x4b   : > { %p495_p5 = scmp.ne.s32.totalorder %s244_s27, %s494_s17  ;;  %p499_p4 = scmp.lt.s32.totalorder %s244_s27, %s756_s3 }
  0x4c   : > { %p500_p10 = scmp.lt.s32.totalorder %s498_s7, %s494_s17 }
  0x4d   : > { %p496_p7 = pnand %p495_p5, %p678_p0 }
  0x4e   : > { %p501_p9 = por %p500_p10, %p499_p4 }
  0x4f   : > { %p497_p6 = pneg %p496_p7 }
  0x51   : > { %p502_p1 = pnand %p501_p9, %p497_p6 }
  0x53   : > { %505 = shalt.err (!%p502_p1)
}
  0x54   : > { %359 = dma.vmem_to_hbm [thread:$0]  (%p678_p0), %s247_s0, 128, %s244_s27, %s232_s21  }
  0x55 PF: > { %s258_s12 = sand.u32 1, %s544_s14   ;;  %p767_p8 = scmp.ne.s32.totalorder %s761_s24, 0 }
  0x56   : > { %p768_p13 = scmp.ge.s32.totalorder %s564_s19, 2  ;;  %s259_s25 = scalar_lea.sflag [#allocation5], %s258_s12 }
  0x58   : > { %p370_p11 = pnand %p768_p13, %p767_p8 }
  0x5a   : > { %p371_p2 = pneg %p370_p11 }
  0x5c   : > { %539 = dma.done.wait (%p371_p2), %s259_s25, 128  }
  0x5d   : > { %541 = vsyncadd (%p371_p2), %s259_s25, 4294967168  ;;  %s21_s19 = sadd.s32 1, %s564_s19   ;;  %s769_s14 = smov %s548_s15 }
  0x5e   : > { %p18_p12 = scmp.ge.s32.totalorder %s21_s19, 4   ;;  %s770_s15 = smov %s552_s16 }
  0x5f   : > { %s771_s16 = smov %s684_s10  ;;  %s772_s17 = smov %s560_s18 }
  0x60   : > { %s773_s18 = smov %s775_s29  ;;  %20 = sbr.rel (!%p18_p12) target bundleno = 9 (0x9), region = 82 }
  0x65   :  { %264 = vsyncpa [#allocation4], 1 }
  0x66   :  { %266 = vsyncpa [#allocation4 + $0x1], 1 }
  0x67   :  { %267 = vsyncpa [#allocation7], 1 }
  0x68   :  { %268 = vsyncpa [#allocation5], 1 }
  0x69   :  { %270 = vsyncpa [#allocation5 + $0x1], 1 }

</bundles_post_ra>
